<compile_context>
chip_gen: v5e
topology: v5e:2x2
jax: 0.10.0
libtpu: 0.0.40
codegen_flags: <defaults>
</compile_context>

<pallas_src>
import functools

import jax
import jax.numpy as jnp
from jax.experimental import pallas as pl
from jax.experimental.pallas import tpu as pltpu


def _round_up(v, m):
    return ((v + m - 1) // m) * m


def _mlp_kernel(*refs, num_layers):
    """Fused MLP on one batch tile.

    refs = (x_ref, w0_ref, b0_ref, ..., w{L-1}_ref, b{L-1}_ref, o_ref)
    """
    x_ref = refs[0]
    o_ref = refs[1 + 2 * num_layers]

    h = x_ref[...]
    for layer in range(num_layers):
        w_ref = refs[1 + 2 * layer]
        b_ref = refs[2 + 2 * layer]
        # bf16 (or stored-dtype) matmul inputs, f32 accumulation on the MXU.
        y = jnp.dot(h.astype(w_ref.dtype), w_ref[...],
                    preferred_element_type=jnp.float32)
        y = y + b_ref[...].astype(jnp.float32)   # (1, N) broadcasts over rows
        if layer < num_layers - 1:
            y = jnp.maximum(y, 0.0)               # ReLU on all but last layer
        h = y
    o_ref[...] = h.astype(o_ref.dtype)


def mlp_forward(params, x, noutput):
    """Fused forward pass.

    params: list of (w, b) with w of shape (in_features, out_features)
            (transposed vs. PyTorch), b of shape (out_features,).
    x:      (batch, ninput)
    """
    M, K = x.shape
    L = len(params)

    # ---- Pad feature dims up to multiples of 128 (lane-dense). -------------
    dims = [K] + [w.shape[1] for (w, _) in params]
    pdims = [_round_up(d, 128) for d in dims]

    padded_params = []
    for l, (w, b) in enumerate(params):
        kin, kout = w.shape
        pin, pout = pdims[l], pdims[l + 1]
        wp = jnp.zeros((pin, pout), w.dtype).at[:kin, :kout].set(w)
        bp = jnp.zeros((1, pout), jnp.float32).at[0, :kout].set(
            b.astype(jnp.float32))
        padded_params.append((wp, bp))

    # ---- Batch tiling (M axis is the only grid axis; weights are resident).
    if M >= 512:
        TM = 512
    elif M >= 128:
        TM = 128
    else:
        TM = _round_up(M, 8)
    M_pad = _round_up(M, TM)
    K_pad, N_pad = pdims[0], pdims[-1]

    xp = jnp.zeros((M_pad, K_pad), x.dtype).at[:M, :K].set(x)

    # ---- BlockSpecs: x / out stream per batch tile; weights stay put. ------
    in_specs = [pl.BlockSpec((TM, K_pad), lambda i: (i, 0))]
    args = [xp]
    for (wp, bp) in padded_params:
        pin, pout = wp.shape
        in_specs.append(pl.BlockSpec((pin, pout), lambda i: (0, 0)))
        in_specs.append(pl.BlockSpec((1, pout), lambda i: (0, 0)))
        args += [wp, bp]
    out_spec = pl.BlockSpec((TM, N_pad), lambda i: (i, 0))

    # ---- VMEM budget (double-buffered streams + resident weights). ---------
    resident = sum(w.size * w.dtype.itemsize + b.size * b.dtype.itemsize
                   for (w, b) in padded_params)
    streamed = 2 * (TM * K_pad * xp.dtype.itemsize
                    + TM * N_pad * jnp.dtype(x.dtype).itemsize)
    vmem_limit = int(2 * resident + streamed + (8 << 20))
    vmem_limit = max(vmem_limit, 32 << 20)
    vmem_limit = min(vmem_limit, 100 << 20)
    # TODO(synk): if resident weights exceed the v7x 64 MiB VMEM budget, add an
    # 'arbitrary' K/N tiling grid axis instead of keeping all weights resident.

    kernel = functools.partial(_mlp_kernel, num_layers=L)
    out = pl.pallas_call(
        kernel,
        out_shape=jax.ShapeDtypeStruct((M_pad, N_pad), x.dtype),
        grid_spec=pltpu.PrefetchScalarGridSpec(
            num_scalar_prefetch=0,
            grid=(M_pad // TM,),
            in_specs=in_specs,
            out_specs=out_spec,
        ),
        compiler_params=pltpu.CompilerParams(
            dimension_semantics=("parallel",),
            vmem_limit_bytes=vmem_limit),
    )(*args)

    return out[:M, :noutput]


def init_mlp_params(key, ninput, nh, noutput, nlayers, w_dtype=jnp.bfloat16):
    """Parameter init mirroring the module's layer shapes.

    Weights stored as (in_features, out_features) in bf16; biases in f32."""
    if nlayers == 1:
        dims = [(ninput, noutput)]
    else:
        dims = [(ninput, nh)] + [(nh, nh)] * (nlayers - 2) + [(nh, noutput)]

    params = []
    for (fan_in, fan_out) in dims:
        key, wk, bk = jax.random.split(key, 3)
        bound = 1.0 / (fan_in ** 0.5)   # torch nn.Linear default scale
        w = jax.random.uniform(wk, (fan_in, fan_out), jnp.float32,
                               -bound, bound).astype(w_dtype)
        b = jax.random.uniform(bk, (fan_out,), jnp.float32, -bound, bound)
        params.append((w, b))
    return params


def mlp_forward_ref(params, x):
    """Pure-JAX reference with identical numerics (bf16 matmul, f32 acc)."""
    h = x
    n = len(params)
    for i, (w, b) in enumerate(params):
        h = jnp.dot(h.astype(w.dtype), w,
                    preferred_element_type=jnp.float32) + b
        if i < n - 1:
            h = jnp.maximum(h, 0.0)
    return h


if __name__ == "__main__":
    # Small shapes consistent with the module: MLP(ninput=32, nh=64, noutput=16, nlayers=3)
    ninput, nh, noutput, nlayers = 32, 64, 16, 3
    batch = 8

    key = jax.random.PRNGKey(0)
    key, xk = jax.random.split(key)
    x = jax.random.normal(xk, (batch, ninput), jnp.float32)

    params = init_mlp_params(key, ninput, nh, noutput, nlayers)

    out = mlp_forward(params, x, noutput)
    out = jax.block_until_ready(out)

    ref = mlp_forward_ref(params, x)
    assert out.shape == (batch, noutput)
    assert jnp.allclose(out, ref, atol=1e-3, rtol=1e-3), "mismatch vs JAX reference"

    print("KERNEL_OK")
</pallas_src>

<mosaic_0001>
module attributes {stable_mosaic.version = 11 : i64} {
  func.func @_mlp_kernel(%arg0: i32, %arg1: memref<8x128xf32, #tpu.memory_space<vmem>>, %arg2: memref<128x128xbf16, #tpu.memory_space<vmem>>, %arg3: memref<1x128xf32, #tpu.memory_space<vmem>>, %arg4: memref<128x128xbf16, #tpu.memory_space<vmem>>, %arg5: memref<1x128xf32, #tpu.memory_space<vmem>>, %arg6: memref<128x128xbf16, #tpu.memory_space<vmem>>, %arg7: memref<1x128xf32, #tpu.memory_space<vmem>>, %arg8: memref<8x128xf32, #tpu.memory_space<vmem>>) attributes {dimension_semantics = [#tpu.dimension_semantics<parallel>], iteration_bounds = array<i64: 1>, scalar_prefetch = 0 : i64, scratch_operands = 0 : i64, tpu.core_type = #tpu.core_type<tc>, window_params = [{transform_indices = @transform_0, window_bounds = array<i64: 8, 128>}, {pipeline_mode = #tpu.pipeline_mode<synchronous>, transform_indices = @transform_1, window_bounds = array<i64: 128, 128>}, {pipeline_mode = #tpu.pipeline_mode<synchronous>, transform_indices = @transform_2, window_bounds = array<i64: 1, 128>}, {pipeline_mode = #tpu.pipeline_mode<synchronous>, transform_indices = @transform_3, window_bounds = array<i64: 128, 128>}, {pipeline_mode = #tpu.pipeline_mode<synchronous>, transform_indices = @transform_4, window_bounds = array<i64: 1, 128>}, {pipeline_mode = #tpu.pipeline_mode<synchronous>, transform_indices = @transform_5, window_bounds = array<i64: 128, 128>}, {pipeline_mode = #tpu.pipeline_mode<synchronous>, transform_indices = @transform_6, window_bounds = array<i64: 1, 128>}, {transform_indices = @transform_7, window_bounds = array<i64: 8, 128>}]} {
    %c0 = arith.constant 0 : index
    %c0_0 = arith.constant 0 : index
    %0 = vector.load %arg1[%c0, %c0_0] : memref<8x128xf32, #tpu.memory_space<vmem>>, vector<8x128xf32>
    %1 = arith.truncf %0 : vector<8x128xf32> to vector<8x128xbf16>
    %c0_1 = arith.constant 0 : index
    %c0_2 = arith.constant 0 : index
    %2 = vector.load %arg2[%c0_1, %c0_2] : memref<128x128xbf16, #tpu.memory_space<vmem>>, vector<128x128xbf16>
    %cst = arith.constant dense<0.000000e+00> : vector<8x128xf32>
    %3 = tpu.matmul %1, %2, %cst {dimension_numbers = #tpu.dot_dimension_numbers<[1], [0], [0], [1], [0, 0, 1, 1], [], []>} : vector<8x128xbf16>, vector<128x128xbf16>, vector<8x128xf32> -> vector<8x128xf32>
    %c0_3 = arith.constant 0 : index
    %c0_4 = arith.constant 0 : index
    %4 = vector.load %arg3[%c0_3, %c0_4] : memref<1x128xf32, #tpu.memory_space<vmem>>, vector<1x128xf32>
    %5 = vector.broadcast %4 : vector<1x128xf32> to vector<8x128xf32>
    %6 = arith.addf %3, %5 : vector<8x128xf32>
    %cst_5 = arith.constant 0.000000e+00 : f32
    %7 = vector.broadcast %cst_5 : f32 to vector<8x128xf32>
    %8 = arith.maximumf %6, %7 : vector<8x128xf32>
    %9 = arith.truncf %8 : vector<8x128xf32> to vector<8x128xbf16>
    %c0_6 = arith.constant 0 : index
    %c0_7 = arith.constant 0 : index
    %10 = vector.load %arg4[%c0_6, %c0_7] : memref<128x128xbf16, #tpu.memory_space<vmem>>, vector<128x128xbf16>
    %cst_8 = arith.constant dense<0.000000e+00> : vector<8x128xf32>
    %11 = tpu.matmul %9, %10, %cst_8 {dimension_numbers = #tpu.dot_dimension_numbers<[1], [0], [0], [1], [0, 0, 1, 1], [], []>} : vector<8x128xbf16>, vector<128x128xbf16>, vector<8x128xf32> -> vector<8x128xf32>
    %c0_9 = arith.constant 0 : index
    %c0_10 = arith.constant 0 : index
    %12 = vector.load %arg5[%c0_9, %c0_10] : memref<1x128xf32, #tpu.memory_space<vmem>>, vector<1x128xf32>
    %13 = vector.broadcast %12 : vector<1x128xf32> to vector<8x128xf32>
    %14 = arith.addf %11, %13 : vector<8x128xf32>
    %cst_11 = arith.constant 0.000000e+00 : f32
    %15 = vector.broadcast %cst_11 : f32 to vector<8x128xf32>
    %16 = arith.maximumf %14, %15 : vector<8x128xf32>
    %17 = arith.truncf %16 : vector<8x128xf32> to vector<8x128xbf16>
    %c0_12 = arith.constant 0 : index
    %c0_13 = arith.constant 0 : index
    %18 = vector.load %arg6[%c0_12, %c0_13] : memref<128x128xbf16, #tpu.memory_space<vmem>>, vector<128x128xbf16>
    %cst_14 = arith.constant dense<0.000000e+00> : vector<8x128xf32>
    %19 = tpu.matmul %17, %18, %cst_14 {dimension_numbers = #tpu.dot_dimension_numbers<[1], [0], [0], [1], [0, 0, 1, 1], [], []>} : vector<8x128xbf16>, vector<128x128xbf16>, vector<8x128xf32> -> vector<8x128xf32>
    %c0_15 = arith.constant 0 : index
    %c0_16 = arith.constant 0 : index
    %20 = vector.load %arg7[%c0_15, %c0_16] : memref<1x128xf32, #tpu.memory_space<vmem>>, vector<1x128xf32>
    %21 = vector.broadcast %20 : vector<1x128xf32> to vector<8x128xf32>
    %22 = arith.addf %19, %21 : vector<8x128xf32>
    %c0_17 = arith.constant 0 : index
    %c0_18 = arith.constant 0 : index
    %23 = vector.load %arg8[%c0_17, %c0_18] : memref<8x128xf32, #tpu.memory_space<vmem>>, vector<8x128xf32>
    tpu.vector_store %arg8[%c0_17, %c0_18], %22 {strides = array<i32>} : memref<8x128xf32, #tpu.memory_space<vmem>>, vector<8x128xf32>,
    return
  }
  func.func @transform_0(%arg0: i32) -> (i32, i32) {
    %c0_i32 = arith.constant 0 : i32
    %c0_i32_0 = arith.constant 0 : i32
    return %arg0, %c0_i32 : i32, i32
  }
  func.func @transform_1(%arg0: i32) -> (i32, i32) {
    %c0_i32 = arith.constant 0 : i32
    %c0_i32_0 = arith.constant 0 : i32
    %c0_i32_1 = arith.constant 0 : i32
    return %c0_i32, %c0_i32_0 : i32, i32
  }
  func.func @transform_2(%arg0: i32) -> (i32, i32) {
    %c0_i32 = arith.constant 0 : i32
    %c0_i32_0 = arith.constant 0 : i32
    %c0_i32_1 = arith.constant 0 : i32
    return %c0_i32, %c0_i32_0 : i32, i32
  }
  func.func @transform_3(%arg0: i32) -> (i32, i32) {
    %c0_i32 = arith.constant 0 : i32
    %c0_i32_0 = arith.constant 0 : i32
    %c0_i32_1 = arith.constant 0 : i32
    return %c0_i32, %c0_i32_0 : i32, i32
  }
  func.func @transform_4(%arg0: i32) -> (i32, i32) {
    %c0_i32 = arith.constant 0 : i32
    %c0_i32_0 = arith.constant 0 : i32
    %c0_i32_1 = arith.constant 0 : i32
    return %c0_i32, %c0_i32_0 : i32, i32
  }
  func.func @transform_5(%arg0: i32) -> (i32, i32) {
    %c0_i32 = arith.constant 0 : i32
    %c0_i32_0 = arith.constant 0 : i32
    %c0_i32_1 = arith.constant 0 : i32
    return %c0_i32, %c0_i32_0 : i32, i32
  }
  func.func @transform_6(%arg0: i32) -> (i32, i32) {
    %c0_i32 = arith.constant 0 : i32
    %c0_i32_0 = arith.constant 0 : i32
    %c0_i32_1 = arith.constant 0 : i32
    return %c0_i32, %c0_i32_0 : i32, i32
  }
  func.func @transform_7(%arg0: i32) -> (i32, i32) {
    %c0_i32 = arith.constant 0 : i32
    %c0_i32_0 = arith.constant 0 : i32
    return %arg0, %c0_i32 : i32, i32
  }
}

</mosaic_0001>

<bundles_post_ra>
// kernel: tpu_custom_call.1
= control target key start
LH: loop header
LB: loop body
LE: loop exit
PB: predicated region body
PF: predicated region fallthrough
CT: control target
= control target key end

     0   :  { %12 = vsyncpa [#allocation3], 0  ;;  %s686_s0 = inlined_call_operand.hbm [shape: f32[8,128], index: 0, kind: input, shape index: {}]   ;;  %s687_s1 = inlined_call_operand.hbm [shape: bf16[128,128], index: 1, kind: input, shape index: {}]   ;;  %s688_s2 = inlined_call_operand.vmem [shape: f32[1,128], index: 2, kind: input, shape index: {}]   ;;  %s689_s3 = inlined_call_operand.hbm [shape: bf16[128,128], index: 3, kind: input, shape index: {}]   ;;  %s690_s4 = inlined_call_operand.vmem [shape: f32[1,128], index: 4, kind: input, shape index: {}]   ;;  %s691_s5 = inlined_call_operand.hbm [shape: bf16[128,128], index: 5, kind: input, shape index: {}]   ;;  %s692_s6 = inlined_call_operand.vmem [shape: f32[1,128], index: 6, kind: input, shape index: {}]   ;;  %s693_s7 = inlined_call_operand.hbm [shape: f32[8,128], index: 7, kind: output, shape index: {}]  }
   0x1   :  { %13 = vsyncpa [#allocation6], 0 }
   0x2   :  { %14 = vsyncpa [#allocation9], 0  ;;  %s31_s26 = sshll.u32 %s687_s1, 4  ;;  %s32_s26 = int_to_ptr.hbm [resolvable:$true] %s31_s26 }
   0x3   :  { %15 = vsyncpa [#allocation4], 0  ;;  %s615_s27 = smov [#allocation5]   ;;  %s21_s8 = sshll.u32 %s686_s0, 4  ;;  %s22_s8 = int_to_ptr.hbm [resolvable:$true] %s21_s8 }
   0x4   :  { %s33_s28 = sshll.u32 %s615_s27, 4  ;;  %s616_s9 = smov 64   ;;  %s34_s28 = int_to_ptr.vmem [resolvable:$true] %s33_s28 }
   0x5   :  { %s617_s10 = smov 4   ;;  %s618_s11 = smov [#allocation2]  }
   0x6   :  { %39 = dma.hbm_to_vmem [thread:$0]  %s32_s26, 1024, %s34_s28, [#allocation6], %s616_s9, %s616_s9, %s617_s10  }
   0x7   :  { %s23_s12 = sshll.u32 %s618_s11, 4  ;;  %s46_s15 = sshll.u32 %s689_s3, 4  ;;  %s24_s12 = int_to_ptr.vmem [resolvable:$true] %s23_s12  ;;  %s47_s15 = int_to_ptr.hbm [resolvable:$true] %s46_s15 }
   0x8   :  { %26 = dma.hbm_to_vmem [thread:$0]  %s22_s8, 128, %s24_s12, [#allocation3]  }
   0x9   :  { %s61_s17 = sshll.u32 %s691_s5, 4  ;;  %s619_s18 = smov [#allocation7]   ;;  %s62_s17 = int_to_ptr.hbm [resolvable:$true] %s61_s17 }
   0xa   :  { %s48_s19 = sshll.u32 %s619_s18, 4  ;;  %s620_s0 = smov [#allocation8]   ;;  %s49_s19 = int_to_ptr.vmem [resolvable:$true] %s48_s19 }
   0xb   :  { %54 = dma.hbm_to_vmem [thread:$0]  %s47_s15, 1024, %s49_s19, [#allocation6], %s616_s9, %s616_s9, %s617_s10  }
   0xc   :  { %s63_s20 = sshll.u32 %s620_s0, 4  ;;  %s64_s20 = int_to_ptr.vmem [resolvable:$true] %s63_s20 }
   0xd   :  { %69 = dma.hbm_to_vmem [thread:$0]  %s62_s17, 1024, %s64_s20, [#allocation9], %s616_s9, %s616_s9, %s617_s10  }
   0xe   :  { %607 = dma.done.wait [#allocation3], 128  }
   0xf   :  { %608 = vsyncadd [#allocation3], 4294967168 }
  0x10   :  { %609 = dma.done.wait [#allocation6], 2048  }
  0x11   :  { %610 = vsyncadd [#allocation6], 4294965248 }
  0x12   :  { %611 = dma.done.wait [#allocation9], 1024  }
  0x13   :  { %612 = vsyncadd [#allocation9], 4294966272  ;;  %v460_v0 = vld [vmem:[#allocation5 + $0x38] sm:$0xff]  ;;  %v459_v1 = vld [vmem:[#allocation5 + $0x30] sm:$0xff]  ;;  %s621_s24 = smov [#allocation10]   ;;  %s345_s28 = sshll.u32 %s693_s7, 4  ;;  %s346_s28 = int_to_ptr.hbm [resolvable:$true] %s345_s28 }
  0x14   :  { %158 = vmatpush.bf16.msra.mxu0 %v460_v0  ;;  %v468_v2 = vld [vmem:[#allocation7 + $0x38] sm:$0xff]  ;;  %v467_v3 = vld [vmem:[#allocation7 + $0x30] sm:$0xff]  ;;  %v458_v4 = vld [vmem:[#allocation5 + $0x28] sm:$0xff]  ;;  %s343_s25 = sshll.u32 %s621_s24, 4  ;;  %s344_s25 = int_to_ptr.vmem [resolvable:$true] %s343_s25 }
  0x15   :  { %241 = vmatpush.bf16.msra.mxu1 %v468_v2  ;;  %v466_v5 = vld [vmem:[#allocation7 + $0x28] sm:$0xff]  ;;  %v457_v6 = vld [vmem:[#allocation5 + $0x20] sm:$0xff]  ;;  %v456_v8 = vld [vmem:[#allocation5 + $0x18] sm:$0xff] }
  0x16   :  { %v465_v7 = vld [vmem:[#allocation7 + $0x20] sm:$0xff]  ;;  %v464_v9 = vld [vmem:[#allocation7 + $0x18] sm:$0xff]  ;;  %v455_v10 = vld [vmem:[#allocation5 + $0x10] sm:$0xff] }
  0x17   :  { %v463_v11 = vld [vmem:[#allocation7 + $0x10] sm:$0xff]  ;;  %v454_v12 = vld [vmem:[#allocation5 + $0x8] sm:$0xff]  ;;  %v453_v13 = vld [vmem:[#allocation5] sm:$0xff] }
  0x18   :  { %159 = vmatpush.bf16.msra.mxu0 %v459_v1  ;;  %v88_v14 = vld [vmem:[#allocation2] sm:$0xff]  ;;  %v462_v16 = vld [vmem:[#allocation7 + $0x8] sm:$0xff]  ;;  %v461_v17 = vld [vmem:[#allocation7] sm:$0xff] }
  0x19   :  { %242 = vmatpush.bf16.msra.mxu1 %v467_v3  ;;  %v89_v15 = vpack.c.bf16 %v88_v14, %v88_v14  ;;  %v476_v18 = vld [vmem:[#allocation8 + $0x38] sm:$0xff]  ;;  %v475_v19 = vld [vmem:[#allocation8 + $0x30] sm:$0xff]  ;;  %v474_v20 = vld [vmem:[#allocation8 + $0x28] sm:$0xff] }
  0x1a   :  { %324 = vmatpush.bf16.msra.mxu2 %v476_v18  ;;  %v473_v21 = vld [vmem:[#allocation8 + $0x20] sm:$0xff]  ;;  %v472_v22 = vld [vmem:[#allocation8 + $0x18] sm:$0xff]  ;;  %v471_v23 = vld [vmem:[#allocation8 + $0x10] sm:$0xff] }
  0x1b   :  { %v484_v24 = vld [vmem:[%s688_s2] ss:$0 sm:$0xff]  ;;  %v470_v30 = vld [vmem:[#allocation8 + $0x8] sm:$0xff]  ;;  %v469_v31 = vld [vmem:[#allocation8] sm:$0xff] }
  0x1c   :  { %160 = vmatpush.bf16.msra.mxu0 %v458_v4  ;;  %v485_v32 = vld [vmem:[%s690_s4] ss:$0 sm:$0xff] }
  0x1d   :  { %243 = vmatpush.bf16.msra.mxu1 %v466_v5  ;;  %v486_v38 = vld [vmem:[%s692_s6] ss:$0 sm:$0xff] }
  0x1e   :  { %325 = vmatpush.bf16.msra.mxu2 %v475_v19 }
  0x20   :  { %161 = vmatpush.bf16.msra.mxu0 %v457_v6 }
  0x21   :  { %244 = vmatpush.bf16.msra.mxu1 %v465_v7 }
  0x22   :  { %326 = vmatpush.bf16.msra.mxu2 %v474_v20 }
  0x24   :  { %162 = vmatpush.bf16.msra.mxu0 %v456_v8 }
  0x25   :  { %245 = vmatpush.bf16.msra.mxu1 %v464_v9 }
  0x26   :  { %327 = vmatpush.bf16.msra.mxu2 %v473_v21 }
  0x28   :  { %163 = vmatpush.bf16.msra.mxu0 %v455_v10 }
  0x29   :  { %246 = vmatpush.bf16.msra.mxu1 %v463_v11 }
  0x2a   :  { %328 = vmatpush.bf16.msra.mxu2 %v472_v22 }
  0x2c   :  { %164 = vmatpush.bf16.msra.mxu0 %v454_v12 }
  0x2d   :  { %247 = vmatpush.bf16.msra.mxu1 %v462_v16 }
  0x2e   :  { %329 = vmatpush.bf16.msra.mxu2 %v471_v23 }
  0x30   :  { %165 = vmatpush.bf16.msra.mxu0 %v453_v13 }
  0x31   :  { %248 = vmatpush.bf16.msra.mxu1 %v461_v17 }
  0x32   :  { %330 = vmatpush.bf16.msra.mxu2 %v470_v30 }
  0x33   :  { %166 = vmatmul.bf16.vlgmr.msra.gmra.mxu0 %v89_v15 }
  0x36   :  { %331 = vmatpush.bf16.msra.mxu2 %v469_v31 }
  0xb0   :  { %v167_v25 = vpop.f32.mrf.mxu0 }
  0xb1   :  { %v168_v26 = vadd.f32 %v484_v24, %v167_v25 }
  0xb3   :  { %v171_v27 = vmax.f32 %v168_v26, 0.0 }
  0xb5   :  { %v172_v28 = vpack.c.bf16 %v171_v27, %v171_v27 }
  0xb7   :  { %249 = vmatmul.bf16.vlgmr.msra.gmra.mxu1 %v172_v28 }
  0xb8   :  { %v169_v29 = vpop.f32.mrf.mxu0 }
 0x134   :  { %v250_v33 = vpop.f32.mrf.mxu1 }
 0x135   :  { %v251_v34 = vadd.f32 %v485_v32, %v250_v33 }
 0x137   :  { %v254_v35 = vmax.f32 %v251_v34, 0.0 }
 0x139   :  { %v255_v36 = vpack.c.bf16 %v254_v35, %v254_v35 }
 0x13b   :  { %332 = vmatmul.bf16.vlgmr.msra.gmra.mxu2 %v255_v36 }
 0x13c   :  { %v252_v37 = vpop.f32.mrf.mxu1 }
 0x1be   :  { %v333_v39 = vpop.f32.mrf.mxu2 }
 0x1bf   :  { %v334_v40 = vadd.f32 %v486_v38, %v333_v39 }
 0x1c1   :  { %337 = vst [vmem:[#allocation10] sm:$0xff] %v334_v40 }
 0x1c2   :  { %348 = dma.vmem_to_hbm [thread:$0]  %s344_s25, 128, %s346_s28, [#allocation4]  }
 0x1c6   :  { %v335_v41 = vpop.f32.mrf.mxu2 }
 0x1c7   :  { %613 = dma.done.wait [#allocation4], 128  }
 0x1c8   :  { %614 = vsyncadd [#allocation4], 4294967168 }
 0x1c9   :  { %353 = vsyncpa [#allocation3], 1 }
 0x1ca   :  { %354 = vsyncpa [#allocation6], 1 }
 0x1cb   :  { %355 = vsyncpa [#allocation9], 1 }
 0x1cc   :  { %356 = vsyncpa [#allocation4], 1 }

</bundles_post_ra>
